<compile_context>
chip_gen: v5e
topology: v5e:2x2
jax: 0.10.0
libtpu: 0.0.40
codegen_flags: <defaults>
</compile_context>

<pallas_src>
import jax
import jax.numpy as jnp
from jax import lax
from jax.experimental import pallas as pl
from jax.experimental.pallas import tpu as pltpu

KH = 7      # axial depthwise kernel size along H
KW = 7      # axial depthwise kernel size along W
PAD = 3     # 'same' padding for kernel 7, dilation 1
BN_EPS = 1e-5
LANE = 128


def _round_up(x, m):
    return (x + m - 1) // m * m


# ---------------------------------------------------------------------------
# exact GELU (erf via Abramowitz & Stegun 7.1.26, |err| < ~1.5e-7).
# TODO(synk): lax.erf has no guaranteed Mosaic lowering; polynomial erf used.
def _erf(x):
    p = 0.3275911
    a1, a2, a3, a4, a5 = (0.254829592, -0.284496736, 1.421413741,
                          -1.453152027, 1.061405429)
    sgn = jnp.where(x >= 0.0, 1.0, -1.0)
    ax = jnp.abs(x)
    u = 1.0 + p * ax
    t = pl.reciprocal(u, approx=True)       # EUP slot (nearly free)
    t = t * (2.0 - u * t)                   # one Newton step -> fp32 accuracy
    poly = ((((a5 * t + a4) * t + a3) * t + a2) * t + a1) * t
    return sgn * (1.0 - poly * jnp.exp(-ax * ax))


def _gelu_exact(x):
    return 0.5 * x * (1.0 + _erf(x * 0.7071067811865476))


# ---------------------------------------------------------------------------
def _compute_y(xw, sk, wx, wsk):
    """pw 1x1 conv of cat(up(x), skip) without materializing the concat.

    xw : (Hh, W2, Cin)  bf16, x already duplicated along W, half H resolution
    sk : (2*Hh, W2, Co) bf16 skip tile
    wx : (Cin, Cp), wsk : (Co, Cp)  f32 split, lane-padded pw weights
    returns y : (2*Hh, W2, Cp) f32. (pw bias omitted: cancelled by training BN.)
    """
    Hh, W2, Cin = xw.shape
    H2 = 2 * Hh
    Co = sk.shape[-1]
    Cp = wx.shape[-1]
    yx = jnp.dot(xw.reshape(Hh * W2, Cin).astype(jnp.float32), wx,
                 preferred_element_type=jnp.float32).reshape(Hh, 1, W2, Cp)
    # nearest 2x upsample along H: free major-dim broadcast + merge.
    yx = jnp.broadcast_to(yx, (Hh, 2, W2, Cp)).reshape(H2, W2, Cp)
    ys = jnp.dot(sk.reshape(H2 * W2, Co).astype(jnp.float32), wsk,
                 preferred_element_type=jnp.float32).reshape(H2, W2, Cp)
    return yx + ys


# ---------------------------------------------------------------------------
# pass 1: per-tile channel (sum, M2) of y, for numerically-stable global BN.
def _pw_stats_kernel(xw_ref, sk_ref, wx_ref, wsk_ref, sums_ref):
    y = _compute_y(xw_ref[0], sk_ref[0], wx_ref[...], wsk_ref[...])
    TH, W2, Cp = y.shape
    yf = y.reshape(TH * W2, Cp)
    s1 = jnp.sum(yf, axis=0, keepdims=True)                 # (1, Cp)
    mu = s1 * (1.0 / (TH * W2))                             # per-tile mean
    d = yf - mu
    m2 = jnp.sum(d * d, axis=0, keepdims=True)              # per-tile M2
    sums_ref[...] = jnp.concatenate([s1, m2], axis=0).reshape(1, 1, 2, Cp)


# ---------------------------------------------------------------------------
# pass 2: pw (recomputed) -> folded BN -> AxialDW -> pw2 -> exact GELU.
def _decoder_main_kernel(x_ref, sk_ref, xh_ref, skh_ref, wx_ref, wsk_ref,
                         scale_ref, shift_ref, w_dwh_ref, w_dwwm_ref,
                         b_dw_ref, w_pw2_ref, b_pw2_ref, out_ref, ypad_ref):
    _, TH2, W2, out_c = out_ref.shape
    Cp = wx_ref.shape[-1]
    in_c = x_ref.shape[-1]
    sk_c = sk_ref.shape[-1]

    scale = scale_ref[...]
    shift = shift_ref[...]

    # ---- center rows: split 1x1 pw + folded BN -----------------------------
    y = _compute_y(x_ref[0], sk_ref[0], wx_ref[...], wsk_ref[...])
    y = y * scale + shift                                   # (TH2, W2, Cp)

    # ---- halo rows for the (7,1) conv: recomputed from tiny halo inputs ----
    # halo x rows are pre-mapped per output row in the wrapper (no H-upsample).
    xh = xh_ref[0].astype(jnp.float32).reshape(2 * PAD * W2, in_c)
    skh = skh_ref[0].astype(jnp.float32).reshape(2 * PAD * W2, sk_c)
    yh = (jnp.dot(xh, wx_ref[...], preferred_element_type=jnp.float32) +
          jnp.dot(skh, wsk_ref[...], preferred_element_type=jnp.float32))
    yh = (yh * scale + shift).reshape(2 * PAD, W2, Cp)
    t = pl.program_id(1)
    top_ok = (t > 0).astype(jnp.float32)                    # image-top padding
    bot_ok = (t < pl.num_programs(1) - 1).astype(jnp.float32)

    # padded-H scratch (halo + center): alignment-free major-dim slices.
    ypad_ref[0:PAD, :, :] = yh[0:PAD] * top_ok
    ypad_ref[PAD:PAD + TH2, :, :] = y
    ypad_ref[PAD + TH2:PAD + TH2 + PAD, :, :] = yh[PAD:2 * PAD] * bot_ok

    # ---- AxialDW: acc = y + dw_h(y) + dw_w(y); conv biases pre-summed ------
    acc = y + b_dw_ref[...]
    for k in range(KH):                                     # (7,1) along H
        acc = acc + ypad_ref[k:k + TH2, :, :] * w_dwh_ref[k:k + 1, :]
    for k in range(KW):                                     # (1,7) along W
        d = k - PAD
        wk = w_dwwm_ref[k]                                  # (W2, Cp), masked
        if d == 0:
            acc = acc + y * wk
        else:
            rolled = pltpu.roll(y, shift=(-d) % W2, axis=1)  # rolled[:,w]=y[:,w+d]
            acc = acc + rolled * wk

    # ---- pw2 (1x1, un-padded out_c lanes) + exact GELU ----------------------
    z = jnp.dot(acc.reshape(TH2 * W2, Cp), w_pw2_ref[...],
                preferred_element_type=jnp.float32) + b_pw2_ref[...]
    out_ref[...] = _gelu_exact(z).reshape(1, TH2, W2, out_c)


# ---------------------------------------------------------------------------
def _pad_lanes(a, cp):
    pad = cp - a.shape[-1]
    a = a.astype(jnp.float32)
    if pad == 0:
        return a
    return jnp.pad(a, [(0, 0)] * (a.ndim - 1) + [(0, pad)])


def _pick_tile_rows(total_rows, row_bytes, budget, min_rows=16):
    """Largest even divisor of total_rows whose working set fits the budget."""
    t = total_rows
    while (t * row_bytes > budget and t % 2 == 0 and (t // 2) >= min_rows
           and (t // 2) % 2 == 0 and total_rows % (t // 2) == 0):
        t //= 2
    return t


def _gather_halo(arr, rows):
    """arr (N, R, W, C) -> (N, nH, k, W, C); out-of-range rows are zeroed."""
    n, r_tot, w, c = arr.shape
    nh, k = rows.shape
    valid = (rows >= 0) & (rows < r_tot)
    idx = jnp.clip(rows, 0, r_tot - 1).reshape(-1)
    g = jnp.take(arr, idx, axis=1).reshape(n, nh, k, w, c)
    return jnp.where(valid[None, :, :, None, None], g, jnp.zeros((), arr.dtype))


def decoder_block_forward_nhwc(x_nhwc, skip_nhwc, params):
    """x: (N,H,W,in_c), skip: (N,2H,2W,out_c) -> (N,2H,2W,out_c), all NHWC."""
    N, H, W, in_c = x_nhwc.shape
    out_c = skip_nhwc.shape[-1]
    H2, W2 = 2 * H, 2 * W
    assert skip_nhwc.shape == (N, H2, W2, out_c)
    Cp = _round_up(out_c, LANE)            # lane-dense channel dim for intermediates

    # ---- weights: split pw rows, lane-pad, precompute masked W taps ---------
    w_pw = params["w_pw"]                                    # (in_c+out_c, out_c)
    wx = _pad_lanes(w_pw[:in_c, :], Cp)
    wsk = _pad_lanes(w_pw[in_c:, :], Cp)
    gamma = _pad_lanes(params["gamma"], Cp)
    beta = _pad_lanes(params["beta"], Cp)
    w_dwh = _pad_lanes(params["w_dwh"], Cp)
    b_dw = _pad_lanes(params["b_dwh"] + params["b_dww"], Cp)  # hoisted bias sum
    w_pw2 = jnp.pad(params["w_pw2"].astype(jnp.float32),
                    ((0, Cp - out_c), (0, 0)))                # (Cp, out_c): un-padded output lanes
    b_pw2 = params["b_pw2"].astype(jnp.float32)               # (1, out_c)
    # NOTE: params["b_pw"] intentionally unused: a bias added before
    # training-mode BatchNorm is exactly cancelled by the mean subtraction.

    w_dww = _pad_lanes(params["w_dww"], Cp)                   # (KW, Cp)
    wcol = jnp.arange(W2, dtype=jnp.int32)[None, :]           # (1, W2)
    koff = jnp.arange(KW, dtype=jnp.int32)[:, None] - PAD     # (KW, 1)
    wmask = ((wcol + koff >= 0) & (wcol + koff < W2)).astype(jnp.float32)
    w_dww_m = w_dww[:, None, :] * wmask[:, :, None]           # (KW, W2, Cp)

    # ---- activations: bf16 HBM storage (f32 compute in-kernel) --------------
    # TODO(synk): move the W duplication of x in-kernel (sublane interleave).
    x_w = jnp.repeat(x_nhwc, 2, axis=2).astype(jnp.bfloat16)  # (N, H, W2, in_c)
    skip_b = skip_nhwc.astype(jnp.bfloat16)                   # (N, H2, W2, out_c)

    # ---- per-generation VMEM limit & byte-targeted tile sizes ---------------
    try:
        info = pltpu.get_tpu_info()
        vmem_cap = int(getattr(info, "vmem_capacity_bytes", 128 * 1024 * 1024))
    except Exception:
        vmem_cap = 128 * 1024 * 1024
    vmem_limit = min(vmem_cap * 5 // 8, 100 * 1024 * 1024)    # ~40 MiB on v7x
    budget = min(vmem_limit // 5, 8 * 1024 * 1024)

    row_bytes1 = W2 * (3 * Cp * 4 + (in_c + out_c) * 2)
    TH1 = _pick_tile_rows(H2, row_bytes1, budget)
    nH1 = H2 // TH1

    row_bytes2 = W2 * (5 * Cp * 4 + 3 * out_c * 4 + (in_c + out_c) * 2)
    TH2 = _pick_tile_rows(H2, row_bytes2, budget)
    nH2 = H2 // TH2
    THx = TH2 // 2

    cparams = dict(vmem_limit_bytes=int(vmem_limit))

    # --------------- pass 1: per-tile (sum, M2) of y --------------------------
    flops_pw = 2 * N * H * W2 * in_c * Cp + 2 * N * H2 * W2 * out_c * Cp
    sums = pl.pallas_call(
        _pw_stats_kernel,
        out_shape=jax.ShapeDtypeStruct((N, nH1, 2, Cp), jnp.float32),
        grid=(N, nH1),
        in_specs=[
            pl.BlockSpec((1, TH1 // 2, W2, in_c), lambda n, h: (n, h, 0, 0)),
            pl.BlockSpec((1, TH1, W2, out_c), lambda n, h: (n, h, 0, 0)),
            pl.BlockSpec((in_c, Cp), lambda n, h: (0, 0)),
            pl.BlockSpec((out_c, Cp), lambda n, h: (0, 0)),
        ],
        out_specs=pl.BlockSpec((1, 1, 2, Cp), lambda n, h: (n, h, 0, 0)),
        compiler_params=pltpu.CompilerParams(
            dimension_semantics=("parallel", "parallel"), **cparams),
        cost_estimate=pl.CostEstimate(
            flops=flops_pw + 5 * N * H2 * W2 * Cp, transcendentals=0,
            bytes_accessed=2 * (x_w.size + skip_b.size)
            + 4 * (wx.size + wsk.size + N * nH1 * 2 * Cp)),
    )(x_w, skip_b, wx, wsk)

    # training-mode BN: Chan's parallel combine of per-tile (sum, M2).
    n_tile = TH1 * W2
    count = N * H2 * W2
    s1 = sums[:, :, 0, :]                                     # (N, nH1, Cp)
    m2 = sums[:, :, 1, :]
    mean = jnp.sum(s1, axis=(0, 1)) / count                   # (Cp,)
    tile_mean = s1 / n_tile
    m2_tot = (jnp.sum(m2, axis=(0, 1))
              + n_tile * jnp.sum((tile_mean - mean) ** 2, axis=(0, 1)))
    var = jnp.maximum(m2_tot / count, 0.0)
    scale = gamma * lax.rsqrt(var + BN_EPS)                   # (1, Cp)
    shift = beta - mean * scale                               # (1, Cp)

    # halo inputs for pass 2 (3 rows above / below each H tile, zero at edges).
    off_sk = jnp.array([j - PAD for j in range(PAD)] +
                       [TH2 + j for j in range(PAD)], dtype=jnp.int32)
    off_x = jnp.array([(j - PAD) // 2 for j in range(PAD)] +
                      [(TH2 + j) // 2 for j in range(PAD)], dtype=jnp.int32)
    t_ids = jnp.arange(nH2, dtype=jnp.int32)
    sk_rows = t_ids[:, None] * TH2 + off_sk[None, :]          # (nH2, 2*PAD)
    x_rows = t_ids[:, None] * THx + off_x[None, :]
    skip_halo = _gather_halo(skip_b, sk_rows).reshape(N * nH2, 2 * PAD, W2, out_c)
    x_halo = _gather_halo(x_w, x_rows).reshape(N * nH2, 2 * PAD, W2, in_c)

    # --------------- pass 2: BN + AxialDW + pw2 + GELU ------------------------
    flops2 = (flops_pw + 2 * N * H2 * W2 * Cp * out_c
              + 2 * (KH + KW + 6) * N * H2 * W2 * Cp
              + 12 * N * H2 * W2 * out_c)
    nh2_const = nH2  # captured by the halo index_maps
    out = pl.pallas_call(
        _decoder_main_kernel,
        out_shape=jax.ShapeDtypeStruct((N, H2, W2, out_c), jnp.float32),
        grid=(N, nH2),
        in_specs=[
            pl.BlockSpec((1, THx, W2, in_c), lambda n, t: (n, t, 0, 0)),
            pl.BlockSpec((1, TH2, W2, out_c), lambda n, t: (n, t, 0, 0)),
            pl.BlockSpec((1, 2 * PAD, W2, in_c),
                         lambda n, t: (n * nh2_const + t, 0, 0, 0)),
            pl.BlockSpec((1, 2 * PAD, W2, out_c),
                         lambda n, t: (n * nh2_const + t, 0, 0, 0)),
            pl.BlockSpec((in_c, Cp), lambda n, t: (0, 0)),
            pl.BlockSpec((out_c, Cp), lambda n, t: (0, 0)),
            pl.BlockSpec((1, Cp), lambda n, t: (0, 0)),
            pl.BlockSpec((1, Cp), lambda n, t: (0, 0)),
            pl.BlockSpec((KH, Cp), lambda n, t: (0, 0)),
            pl.BlockSpec((KW, W2, Cp), lambda n, t: (0, 0, 0)),
            pl.BlockSpec((1, Cp), lambda n, t: (0, 0)),
            pl.BlockSpec((Cp, out_c), lambda n, t: (0, 0)),
            pl.BlockSpec((1, out_c), lambda n, t: (0, 0)),
        ],
        out_specs=pl.BlockSpec((1, TH2, W2, out_c), lambda n, t: (n, t, 0, 0)),
        scratch_shapes=[pltpu.VMEM((TH2 + 2 * PAD, W2, Cp), jnp.float32)],
        compiler_params=pltpu.CompilerParams(
            dimension_semantics=("parallel", "parallel"), **cparams),
        cost_estimate=pl.CostEstimate(
            flops=flops2, transcendentals=2 * N * H2 * W2 * out_c,
            bytes_accessed=2 * (x_w.size + skip_b.size + x_halo.size
                                + skip_halo.size)
            + 4 * (N * H2 * W2 * out_c + w_dww_m.size + Cp * out_c)),
    )(x_w, skip_b, x_halo, skip_halo, wx, wsk, scale, shift,
      w_dwh, w_dww_m, b_dw, w_pw2, b_pw2)

    return out


def decoder_block_forward(x, skip, params):
    """NCHW wrapper mirroring the PyTorch module: x (N,in_c,H,W), skip (N,out_c,2H,2W)."""
    # TODO(synk): NHWC consumers should call decoder_block_forward_nhwc directly
    # and skip these layout round-trips.
    x_nhwc = jnp.transpose(x, (0, 2, 3, 1))
    skip_nhwc = jnp.transpose(skip, (0, 2, 3, 1))
    out_nhwc = decoder_block_forward_nhwc(x_nhwc, skip_nhwc, params)
    return jnp.transpose(out_nhwc, (0, 3, 1, 2))


def init_params(key, in_c, out_c):
    """Weights in TPU-friendly layouts (comments give the torch mapping)."""
    Ct = in_c + out_c
    ks = jax.random.split(key, 10)

    def rnd(k, shape, scale=0.1):
        return scale * jax.random.normal(k, shape, dtype=jnp.float32)

    return {
        "w_pw":  rnd(ks[0], (Ct, out_c)),       # torch pw.weight[:, :, 0, 0].T
        "b_pw":  rnd(ks[1], (1, out_c)),        # unused (cancelled by training BN)
        "gamma": 1.0 + rnd(ks[2], (1, out_c)),  # bn.weight
        "beta":  rnd(ks[3], (1, out_c)),        # bn.bias
        "w_dwh": rnd(ks[4], (KH, out_c)),       # torch dw_h.weight[:, 0, :, 0].T
        "b_dwh": rnd(ks[5], (1, out_c)),
        "w_dww": rnd(ks[6], (KW, out_c)),       # torch dw_w.weight[:, 0, 0, :].T
        "b_dww": rnd(ks[7], (1, out_c)),
        "w_pw2": rnd(ks[8], (out_c, out_c)),    # torch pw2.weight[:, :, 0, 0].T
        "b_pw2": rnd(ks[9], (1, out_c)),
    }


if __name__ == "__main__":
    key = jax.random.PRNGKey(0)
    k_x, k_skip, k_params = jax.random.split(key, 3)

    N, in_c, out_c, H, W = 2, 8, 4, 8, 8
    x = jax.random.normal(k_x, (N, in_c, H, W), dtype=jnp.float32)
    skip = jax.random.normal(k_skip, (N, out_c, 2 * H, 2 * W), dtype=jnp.float32)
    params = init_params(k_params, in_c, out_c)

    out = decoder_block_forward(x, skip, params)
    out = jax.block_until_ready(out)
    assert out.shape == (N, out_c, 2 * H, 2 * W)
    assert bool(jnp.all(jnp.isfinite(out)))
    print("KERNEL_OK")
</pallas_src>

<mosaic_0001>
module attributes {stable_mosaic.version = 11 : i64} {
  func.func @_pw_stats_kernel(%arg0: i32, %arg1: i32, %arg2: memref<1x8x16x8xbf16, #tpu.memory_space<vmem>>, %arg3: memref<1x16x16x4xbf16, #tpu.memory_space<vmem>>, %arg4: memref<8x128xf32, #tpu.memory_space<vmem>>, %arg5: memref<4x128xf32, #tpu.memory_space<vmem>>, %arg6: memref<1x1x2x128xf32, #tpu.memory_space<vmem>>) attributes {dimension_semantics = [#tpu.dimension_semantics<parallel>, #tpu.dimension_semantics<parallel>], iteration_bounds = array<i64: 2, 1>, scalar_prefetch = 0 : i64, scratch_operands = 0 : i64, tpu.core_type = #tpu.core_type<tc>, window_params = [{transform_indices = @transform_0, window_bounds = array<i64: 1, 8, 16, 8>}, {transform_indices = @transform_1, window_bounds = array<i64: 1, 16, 16, 4>}, {pipeline_mode = #tpu.pipeline_mode<synchronous>, transform_indices = @transform_2, window_bounds = array<i64: 8, 128>}, {pipeline_mode = #tpu.pipeline_mode<synchronous>, transform_indices = @transform_3, window_bounds = array<i64: 4, 128>}, {transform_indices = @transform_4, window_bounds = array<i64: 1, 1, 2, 128>}]} {
    %c0 = arith.constant 0 : index
    %c0_0 = arith.constant 0 : index
    %c0_1 = arith.constant 0 : index
    %c0_2 = arith.constant 0 : index
    %0 = vector.load %arg2[%c0, %c0_0, %c0_1, %c0_2] : memref<1x8x16x8xbf16, #tpu.memory_space<vmem>>, vector<1x8x16x8xbf16>
    %1 = vector.shape_cast %0 : vector<1x8x16x8xbf16> to vector<8x16x8xbf16>
    %c0_3 = arith.constant 0 : index
    %c0_4 = arith.constant 0 : index
    %c0_5 = arith.constant 0 : index
    %c0_6 = arith.constant 0 : index
    %2 = vector.load %arg3[%c0_3, %c0_4, %c0_5, %c0_6] : memref<1x16x16x4xbf16, #tpu.memory_space<vmem>>, vector<1x16x16x4xbf16>
    %3 = vector.shape_cast %2 : vector<1x16x16x4xbf16> to vector<16x16x4xbf16>
    %c0_7 = arith.constant 0 : index
    %c0_8 = arith.constant 0 : index
    %4 = vector.load %arg4[%c0_7, %c0_8] : memref<8x128xf32, #tpu.memory_space<vmem>>, vector<8x128xf32>
    %c0_9 = arith.constant 0 : index
    %c0_10 = arith.constant 0 : index
    %5 = vector.load %arg5[%c0_9, %c0_10] : memref<4x128xf32, #tpu.memory_space<vmem>>, vector<4x128xf32>
    %6 = vector.shape_cast %1 : vector<8x16x8xbf16> to vector<128x8xbf16>
    %7 = arith.extf %6 : vector<128x8xbf16> to vector<128x8xf32>
    %cst = arith.constant dense<0.000000e+00> : vector<128x128xf32>
    %8 = tpu.matmul %7, %4, %cst {dimension_numbers = #tpu.dot_dimension_numbers<[1], [0], [0], [1], [0, 0, 1, 1], [], []>} : vector<128x8xf32>, vector<8x128xf32>, vector<128x128xf32> -> vector<128x128xf32>
    %9 = vector.shape_cast %8 : vector<128x128xf32> to vector<8x1x16x128xf32>
    %10 = vector.shape_cast %9 : vector<8x1x16x128xf32> to vector<8x1x16x128xf32>
    %11 = vector.broadcast %10 : vector<8x1x16x128xf32> to vector<8x2x16x128xf32>
    %12 = vector.shape_cast %11 : vector<8x2x16x128xf32> to vector<16x16x128xf32>
    %13 = vector.shape_cast %3 : vector<16x16x4xbf16> to vector<256x4xbf16>
    %14 = arith.extf %13 : vector<256x4xbf16> to vector<256x4xf32>
    %cst_11 = arith.constant dense<0.000000e+00> : vector<256x128xf32>
    %15 = tpu.matmul %14, %5, %cst_11 {dimension_numbers = #tpu.dot_dimension_numbers<[1], [0], [0], [1], [0, 0, 1, 1], [], []>} : vector<256x4xf32>, vector<4x128xf32>, vector<256x128xf32> -> vector<256x128xf32>
    %16 = vector.shape_cast %15 : vector<256x128xf32> to vector<16x16x128xf32>
    %17 = arith.addf %12, %16 : vector<16x16x128xf32>
    %18 = vector.shape_cast %17 : vector<16x16x128xf32> to vector<256x128xf32>
    %cst_12 = arith.constant dense<0.000000e+00> : vector<128xf32>
    %19 = vector.multi_reduction <add>, %18, %cst_12 [0] : vector<256x128xf32> to vector<128xf32>
    %20 = vector.shape_cast %19 : vector<128xf32> to vector<1x128xf32>
    %cst_13 = arith.constant 3.906250e-03 : f32
    %21 = vector.broadcast %cst_13 : f32 to vector<1x128xf32>
    %22 = arith.mulf %20, %21 : vector<1x128xf32>
    %23 = vector.broadcast %22 : vector<1x128xf32> to vector<256x128xf32>
    %24 = arith.subf %18, %23 : vector<256x128xf32>
    %25 = arith.mulf %24, %24 : vector<256x128xf32>
    %cst_14 = arith.constant dense<0.000000e+00> : vector<128xf32>
    %26 = vector.multi_reduction <add>, %25, %cst_14 [0] : vector<256x128xf32> to vector<128xf32>
    %27 = vector.shape_cast %26 : vector<128xf32> to vector<1x128xf32>
    %28 = tpu.concatenate %20, %27 in 0 : vector<1x128xf32>, vector<1x128xf32> -> vector<2x128xf32>
    %29 = vector.shape_cast %28 : vector<2x128xf32> to vector<1x1x2x128xf32>
    %c0_15 = arith.constant 0 : index
    %c0_16 = arith.constant 0 : index
    %c0_17 = arith.constant 0 : index
    %c0_18 = arith.constant 0 : index
    %30 = vector.load %arg6[%c0_15, %c0_16, %c0_17, %c0_18] : memref<1x1x2x128xf32, #tpu.memory_space<vmem>>, vector<1x1x2x128xf32>
    tpu.vector_store %arg6[%c0_15, %c0_16, %c0_17, %c0_18], %29 {strides = array<i32>} : memref<1x1x2x128xf32, #tpu.memory_space<vmem>>, vector<1x1x2x128xf32>,
    return
  }
  func.func @transform_0(%arg0: i32, %arg1: i32) -> (i32, i32, i32, i32) {
    %c0_i32 = arith.constant 0 : i32
    %c0_i32_0 = arith.constant 0 : i32
    %c0_i32_1 = arith.constant 0 : i32
    return %arg0, %arg1, %c0_i32, %c0_i32_0 : i32, i32, i32, i32
  }
  func.func @transform_1(%arg0: i32, %arg1: i32) -> (i32, i32, i32, i32) {
    %c0_i32 = arith.constant 0 : i32
    %c0_i32_0 = arith.constant 0 : i32
    %c0_i32_1 = arith.constant 0 : i32
    return %arg0, %arg1, %c0_i32, %c0_i32_0 : i32, i32, i32, i32
  }
  func.func @transform_2(%arg0: i32, %arg1: i32) -> (i32, i32) {
    %c0_i32 = arith.constant 0 : i32
    %c0_i32_0 = arith.constant 0 : i32
    %c0_i32_1 = arith.constant 0 : i32
    return %c0_i32, %c0_i32_0 : i32, i32
  }
  func.func @transform_3(%arg0: i32, %arg1: i32) -> (i32, i32) {
    %c0_i32 = arith.constant 0 : i32
    %c0_i32_0 = arith.constant 0 : i32
    %c0_i32_1 = arith.constant 0 : i32
    return %c0_i32, %c0_i32_0 : i32, i32
  }
  func.func @transform_4(%arg0: i32, %arg1: i32) -> (i32, i32, i32, i32) {
    %c0_i32 = arith.constant 0 : i32
    %c0_i32_0 = arith.constant 0 : i32
    %c0_i32_1 = arith.constant 0 : i32
    return %arg0, %arg1, %c0_i32, %c0_i32_0 : i32, i32, i32, i32
  }
}

</mosaic_0001>

<bundles_post_ra>
// kernel: tpu_custom_call.1
= control target key start
LH: loop header
LB: loop body
LE: loop exit
PB: predicated region body
PF: predicated region fallthrough
CT: control target
= control target key end

     0   :  { %9 = vsyncpa [#allocation3], 0  ;;  %s1699_s0 = inlined_call_operand.vmem [shape: bf16[2,8,16,8], index: 0, kind: input, shape index: {}]   ;;  %s1700_s1 = inlined_call_operand.vmem [shape: bf16[2,16,16,4], index: 1, kind: input, shape index: {}]   ;;  %s1701_s2 = inlined_call_operand.vmem [shape: f32[8,128], index: 2, kind: input, shape index: {}]   ;;  %s1702_s3 = inlined_call_operand.vmem [shape: f32[4,128], index: 3, kind: input, shape index: {}]   ;;  %s1703_s4 = inlined_call_operand.hbm [shape: f32[2,1,2,128], index: 4, kind: output, shape index: {}]  }
   0x1   :  { %11 = vsyncpa [#allocation3 + $0x1], 0  ;;  %s1329_s15 = smov 0   ;;  %s1331_s16 = smov 0  }
   0x2   :  { %s1333_s17 = smov 0   ;;  %s1335_s18 = smov 0  }
   0x3   :  { %s1337_s19 = smov 0   ;;  %s1339_s20 = smov 0  }
   0x4 LB: > { %s983_s21 = sadd.s32 4294967295, %s1302_s20   ;;  %s984_s22 = sadd.s32 4294967294, %s1302_s20   ;;  %s1302_s20 = sphi %s1339_s20, %s17_s20   ;;  %s1298_s19 = sphi %s1337_s19, %s1710_s19   ;;  %s1294_s18 = sphi %s1335_s18, %s1709_s18   ;;  %s1290_s17 = sphi %s1333_s17, %s1708_s17   ;;  %s1286_s16 = sphi %s1331_s16, %s1707_s16   ;;  %s1282_s15 = sphi %s1329_s15, %s1706_s15  }
   0x5   : > { %s29_s23 = sadd.s32 1, %s1298_s19  ;;  %s136_s24 = sadd.s32 1, %s1290_s17 }
   0x6   : > { %p31_p0 = scmp.ge.s32.totalorder %s29_s23, 2  ;;  %p146_p1 = scmp.ne.s32.totalorder %s1290_s17, %s1286_s16 }
   0x7   : > { %p147_p2 = scmp.eq.s32.totalorder %s983_s21, 1  ;;  %p152_p3 = scmp.ne.s32.totalorder %s1286_s16, %s1282_s15 }
   0x8   : > { %s1712_s23 = smov (%p31_p0, %s29_s23), 0  ;;  %p153_p5 = scmp.eq.s32.totalorder %s984_s22, 1 }
   0x9   : > { %p1369_p4 = por %p147_p2, %p146_p1  ;;  %s131_s26 = ssub.s32 %s1298_s19, %s1712_s23 }
   0xa   : > { %p987_p6 = scmp.ge.s32.totalorder %s1302_s20, 1  ;;  %p134_p7 = scmp.eq.s32.totalorder %s131_s26, 0 }
   0xb   : > { %p1376_p8 = por %p153_p5, %p152_p3  ;;  %p205_p9 = scmp.lt.s32.totalorder %s1302_s20, 3 }
   0xc   : > { %s1382_s28 = scalar_select %p134_p7, %s1290_s17, %s136_s24  }
   0xd   : > { %p206_p10 = pnand %p987_p6, %p205_p9 }
   0xe   : > { %p247_p11 = scmp.lt.s32.totalorder (!%p206_p10), %s1294_s18, 1  ;;  %s243_s22 = sand.u32 (!%p206_p10), 1, %s1286_s16  }
   0xf   : > { %209 = sbr.rel (%p206_p10) target bundleno = 382 (0x17e), region = 36  ;;  %s988_s24 = sshll.u32 (!%p206_p10), %s243_s22, 1 }
  0x10   : > { %s1043_s26 = sshll.u32 (!%p206_p10), %s1294_s18, 1  ;;  %s245_s6 = scalar_lea.vmem (!%p206_p10), [#allocation2], %s988_s24 }
  0x11   : > { %s880_s5 = scalar_lea.hbm (!%p206_p10), %s1703_s4, %s1043_s26  ;;  %s1244_s13 = scalar_lea.hbm (!%p206_p10), %s1703_s4, 4 }
  0x14   : > { %v316_v0 = vld [vmem:[%s1701_s2] sm:$0xff]  ;;  %vm577_vm0 = vcmask 1043456   ;;  %s248_s7 = scalar_select %p247_p11, %s1294_s18, 1  ;;  %vm334_vm1 = vcmask 64512   ;;  %vm480_vm2 = vcmask 31744   ;;  %vm865_vm3 = vcmask 1040384  }
  0x15   : > { %v317_v1 = vld [vmem:[%s1702_s3] sm:$0xf]  ;;  %398 = vmatpush.msra.mxu0 %v316_v0  ;;  %1166 = vmatpush.msra.mxu3 %v316_v0 }
  0x16   : > { %1009 = vmatpush.msk.msra.mxu1 %vm577_vm0, %v317_v1  ;;  %1167 = vmatpush.msk.msra.mxu2 %vm577_vm0, %v317_v1  ;;  %s1046_s8 = sshll.u32 %s248_s7, 6  ;;  %s1047_s9 = sshll.u32 %s248_s7, 7 }
  0x17   : > { %1168 = vmatpush.msk.msrb.mxu3 %vm577_vm0, %v317_v1  ;;  %s1395_s12 = scalar_lea.vmem %s1699_s0, %s1046_s8  ;;  %s1400_s21 = scalar_lea.vmem %s1700_s1, %s1047_s9 }
  0x18   : > { %v1049_v2 = vld [vmem:[%s1395_s12] sm:$0xff]   ;;  %v1149_v3 = vld [vmem:[%s1395_s12 + $0x30] sm:$0xff]   ;;  %v1144_v14 = vld [vmem:[%s1395_s12 + $0x8] sm:$0xff]   ;;  %s882_s7 = sshll.u32 %s245_s6, 4  ;;  %s884_s8 = sshll.u32 %s880_s5, 4  ;;  %s883_s7 = int_to_ptr.vmem [resolvable:$true] %s882_s7  ;;  %s885_s8 = int_to_ptr.hbm [resolvable:$true] %s884_s8 }
  0x19   : > { %v1081_v4 = vld [vmem:[%s1400_s21] sm:$0xff]   ;;  %v1050_v5 = vunpack.c.l.bf16 %v1049_v2  ;;  %v1074_v6 = vunpack.c.l.bf16 %v1149_v3  ;;  %v1156_v8 = vld [vmem:[%s1400_s21 + $0x30] sm:$0xff]   ;;  %v1051_v10 = vunpack.c.h.bf16 %v1049_v2  ;;  %v1075_v11 = vunpack.c.h.bf16 %v1149_v3  ;;  %v1150_v15 = vld [vmem:[%s1395_s12 + $0x38] sm:$0xff]   ;;  %s869_s9 = scalar_lea.sflag [#allocation3], %s243_s22  ;;  %s1238_s18 = sshra.s32 %s885_s8, 4  ;;  %s1239_s18 = int_to_ptr.hbm [resolvable:$true] %s1238_s18 }
  0x1a   : > { %v1082_v7 = vunpack.c.l.bf16 %v1081_v4  ;;  %v1106_v9 = vunpack.c.l.bf16 %v1156_v8  ;;  %v1083_v12 = vunpack.c.h.bf16 %v1081_v4  ;;  %v1107_v13 = vunpack.c.h.bf16 %v1156_v8  ;;  %v1151_v16 = vld [vmem:[%s1400_s21 + $0x8] sm:$0xff]   ;;  %v1157_v17 = vld [vmem:[%s1400_s21 + $0x38] sm:$0xff]   ;;  %v1145_v26 = vld [vmem:[%s1395_s12 + $0x10] sm:$0xff]   ;;  %s1240_s10 = scalar_lea.hbm %s1239_s18, 2  ;;  %p1245_p1 = scmp.lt.s32.totalorder %s1239_s18, %s1703_s4 }
  0x1b   : > { %993 = vmatmul.msk.f32.vlgmr.msra.gmra.mxu0 %vm334_vm1, %v1050_v5  ;;  %1005 = vmatmul.msk.f32.vlgmr.msra.gmra.mxu3 %vm334_vm1, %v1074_v6  ;;  %v1054_v18 = vunpack.c.l.bf16 %v1144_v14  ;;  %v1078_v19 = vunpack.c.l.bf16 %v1150_v15  ;;  %v1086_v20 = vunpack.c.l.bf16 %v1151_v16  ;;  %v1110_v21 = vunpack.c.l.bf16 %v1157_v17  ;;  %v1162_v27 = vld [vmem:[%s1400_s21 + $0x60] sm:$0xff]   ;;  %v1152_v28 = vld [vmem:[%s1400_s21 + $0x10] sm:$0xff]   ;;  %v1146_v38 = vld [vmem:[%s1395_s12 + $0x18] sm:$0xff]   ;;  %p1241_p12 = scmp.ne.s32.totalorder %s1239_s18, %s1240_s10  ;;  %p1246_p2 = scmp.lt.s32.totalorder %s1244_s13, %s1240_s10 }
  0x1c   : > { %1010 = vmatmul.msk.f32.vlgmr.msra.gmra.mxu1 %vm480_vm2, %v1082_v7  ;;  %1022 = vmatmul.msk.f32.vlgmr.msra.gmra.mxu2 %vm480_vm2, %v1106_v9  ;;  %v1055_v22 = vunpack.c.h.bf16 %v1144_v14  ;;  %v1079_v23 = vunpack.c.h.bf16 %v1150_v15  ;;  %v1087_v24 = vunpack.c.h.bf16 %v1151_v16  ;;  %v1111_v25 = vunpack.c.h.bf16 %v1157_v17  ;;  %v1158_v29 = vld [vmem:[%s1400_s21 + $0x40] sm:$0xff]   ;;  %v1163_v39 = vld [vmem:[%s1400_s21 + $0x68] sm:$0xff]   ;;  %v1153_v40 = vld [vmem:[%s1400_s21 + $0x18] sm:$0xff]  }
  0x1d   : > { %v1058_v30 = vunpack.c.l.bf16 %v1145_v26  ;;  %v1130_v31 = vunpack.c.l.bf16 %v1162_v27  ;;  %v1090_v32 = vunpack.c.l.bf16 %v1152_v28  ;;  %v1114_v33 = vunpack.c.l.bf16 %v1158_v29  ;;  %v1159_v41 = vld [vmem:[%s1400_s21 + $0x48] sm:$0xff]   ;;  %v1147_v50 = vld [vmem:[%s1395_s12 + $0x20] sm:$0xff]   ;;  %v1164_v51 = vld [vmem:[%s1400_s21 + $0x70] sm:$0xff]   ;;  %p1242_p13 = pnand %p1241_p12, %p1369_p4  ;;  %p1247_p3 = por %p1246_p2, %p1245_p1 }
  0x1e   : > { %v1059_v34 = vunpack.c.h.bf16 %v1145_v26  ;;  %v1131_v35 = vunpack.c.h.bf16 %v1162_v27  ;;  %v1091_v36 = vunpack.c.h.bf16 %v1152_v28  ;;  %v1115_v37 = vunpack.c.h.bf16 %v1158_v29  ;;  %v1154_v52 = vld [vmem:[%s1400_s21 + $0x20] sm:$0xff]   ;;  %v1160_v53 = vld [vmem:[%s1400_s21 + $0x50] sm:$0xff]   ;;  %v1165_v62 = vld [vmem:[%s1400_s21 + $0x78] sm:$0xff]  }
  0x1f   : > { %v1062_v42 = vunpack.c.l.bf16 %v1146_v38  ;;  %v1134_v43 = vunpack.c.l.bf16 %v1163_v39  ;;  %v1094_v44 = vunpack.c.l.bf16 %v1153_v40  ;;  %v1118_v45 = vunpack.c.l.bf16 %v1159_v41  ;;  %v1148_v63 = vld [vmem:[%s1395_s12 + $0x28] sm:$0xff]   ;;  %v1161_v1 = vld [vmem:[%s1400_s21 + $0x58] sm:$0xff]   ;;  %p1243_p0 = pneg %p1242_p13 }
  0x20   : > { %v1063_v46 = vunpack.c.h.bf16 %v1146_v38  ;;  %v1135_v47 = vunpack.c.h.bf16 %v1163_v39  ;;  %v1095_v48 = vunpack.c.h.bf16 %v1153_v40  ;;  %v1119_v49 = vunpack.c.h.bf16 %v1159_v41  ;;  %v1155_v0 = vld [vmem:[%s1400_s21 + $0x28] sm:$0xff]  }
  0x21   : > { %v1066_v54 = vunpack.c.l.bf16 %v1147_v50  ;;  %v1138_v55 = vunpack.c.l.bf16 %v1164_v51  ;;  %v1098_v56 = vunpack.c.l.bf16 %v1154_v52  ;;  %v1122_v57 = vunpack.c.l.bf16 %v1160_v53  ;;  %p1248_p5 = pnand %p1247_p3, %p1243_p0 }
  0x22   : > { %v1067_v58 = vunpack.c.h.bf16 %v1147_v50  ;;  %v1139_v59 = vunpack.c.h.bf16 %v1164_v51  ;;  %v1099_v60 = vunpack.c.h.bf16 %v1154_v52  ;;  %v1123_v61 = vunpack.c.h.bf16 %v1160_v53 }
  0x23   : > { %994 = vmatmul.msk.f32.gmra.mxu0 %vm334_vm1, %v1051_v10  ;;  %1006 = vmatmul.msk.f32.gmra.mxu3 %vm334_vm1, %v1075_v11  ;;  %v1142_v2 = vunpack.c.l.bf16 %v1165_v62  ;;  %v1070_v3 = vunpack.c.l.bf16 %v1148_v63  ;;  %v1102_v4 = vunpack.c.l.bf16 %v1155_v0  ;;  %v1126_v5 = vunpack.c.l.bf16 %v1161_v1 }
  0x24   : > { %1011 = vmatmul.msk.f32.gmra.mxu1 %vm480_vm2, %v1083_v12  ;;  %1023 = vmatmul.msk.f32.gmra.mxu2 %vm480_vm2, %v1107_v13  ;;  %v1143_v6 = vunpack.c.h.bf16 %v1165_v62  ;;  %v1071_v7 = vunpack.c.h.bf16 %v1148_v63  ;;  %v1103_v8 = vunpack.c.h.bf16 %v1155_v0  ;;  %v1127_v9 = vunpack.c.h.bf16 %v1161_v1 }
  0x2b   : > { %995 = vmatmul.msk.f32.gmra.mxu0 %vm334_vm1, %v1054_v18  ;;  %1007 = vmatmul.msk.f32.gmra.mxu3 %vm334_vm1, %v1078_v19 }
  0x2c   : > { %1012 = vmatmul.msk.f32.gmra.mxu1 %vm480_vm2, %v1086_v20  ;;  %1024 = vmatmul.msk.f32.gmra.mxu2 %vm480_vm2, %v1110_v21 }
  0x33   : > { %996 = vmatmul.msk.f32.gmra.mxu0 %vm334_vm1, %v1055_v22  ;;  %1008 = vmatmul.msk.f32.gmra.mxu3 %vm334_vm1, %v1079_v23 }
  0x34   : > { %1013 = vmatmul.msk.f32.gmra.mxu1 %vm480_vm2, %v1087_v24  ;;  %1025 = vmatmul.msk.f32.gmra.mxu2 %vm480_vm2, %v1111_v25 }
  0x3b   : > { %997 = vmatmul.msk.f32.gmra.mxu0 %vm334_vm1, %v1058_v30  ;;  %1034 = vmatmul.msk.f32.vlgmr.msrb.gmra.mxu3 %vm480_vm2, %v1130_v31 }
  0x3c   : > { %1014 = vmatmul.msk.f32.gmra.mxu1 %vm480_vm2, %v1090_v32  ;;  %1026 = vmatmul.msk.f32.gmra.mxu2 %vm480_vm2, %v1114_v33 }
  0x43   : > { %998 = vmatmul.msk.f32.gmra.mxu0 %vm334_vm1, %v1059_v34  ;;  %1035 = vmatmul.msk.f32.gmra.mxu3 %vm480_vm2, %v1131_v35 }
  0x44   : > { %1015 = vmatmul.msk.f32.gmra.mxu1 %vm480_vm2, %v1091_v36  ;;  %1027 = vmatmul.msk.f32.gmra.mxu2 %vm480_vm2, %v1115_v37 }
  0x4b   : > { %999 = vmatmul.msk.f32.gmra.mxu0 %vm334_vm1, %v1062_v42  ;;  %1036 = vmatmul.msk.f32.gmra.mxu3 %vm480_vm2, %v1134_v43 }
  0x4c   : > { %1016 = vmatmul.msk.f32.gmra.mxu1 %vm480_vm2, %v1094_v44  ;;  %1028 = vmatmul.msk.f32.gmra.mxu2 %vm480_vm2, %v1118_v45 }
  0x53   : > { %1000 = vmatmul.msk.f32.gmra.mxu0 %vm334_vm1, %v1063_v46  ;;  %1037 = vmatmul.msk.f32.gmra.mxu3 %vm480_vm2, %v1135_v47 }
  0x54   : > { %1017 = vmatmul.msk.f32.gmra.mxu1 %vm480_vm2, %v1095_v48  ;;  %1029 = vmatmul.msk.f32.gmra.mxu2 %vm480_vm2, %v1119_v49 }
  0x5b   : > { %1001 = vmatmul.msk.f32.gmra.mxu0 %vm334_vm1, %v1066_v54  ;;  %1038 = vmatmul.msk.f32.gmra.mxu3 %vm480_vm2, %v1138_v55 }
  0x5c   : > { %1018 = vmatmul.msk.f32.gmra.mxu1 %vm480_vm2, %v1098_v56  ;;  %1030 = vmatmul.msk.f32.gmra.mxu2 %vm480_vm2, %v1122_v57 }
  0x63   : > { %1002 = vmatmul.msk.f32.gmra.mxu0 %vm334_vm1, %v1067_v58  ;;  %1039 = vmatmul.msk.f32.gmra.mxu3 %vm480_vm2, %v1139_v59 }
  0x64   : > { %1019 = vmatmul.msk.f32.gmra.mxu1 %vm480_vm2, %v1099_v60  ;;  %1031 = vmatmul.msk.f32.gmra.mxu2 %vm480_vm2, %v1123_v61 }
  0x6b   : > { %1040 = vmatmul.msk.f32.gmra.mxu3 %vm480_vm2, %v1142_v2  ;;  %1003 = vmatmul.msk.f32.gmra.mxu0 %vm334_vm1, %v1070_v3 }
  0x6c   : > { %1020 = vmatmul.msk.f32.gmra.mxu1 %vm480_vm2, %v1102_v4  ;;  %1032 = vmatmul.msk.f32.gmra.mxu2 %vm480_vm2, %v1126_v5 }
  0x73   : > { %1041 = vmatmul.msk.f32.gmra.mxu3 %vm480_vm2, %v1143_v6  ;;  %1004 = vmatmul.msk.f32.gmra.mxu0 %vm334_vm1, %v1071_v7 }
  0x74   : > { %1021 = vmatmul.msk.f32.gmra.mxu1 %vm480_vm2, %v1103_v8  ;;  %1033 = vmatmul.msk.f32.gmra.mxu2 %vm480_vm2, %v1127_v9 }
  0x98   : > { %v400_v10 = vpop.f32.mrf.mxu0 }
  0x99   : > { %v598_v11 = vpop.f32.mrf.mxu1 }
  0x9a   : > { %v1488_v41 = vadd.f32 %v598_v11, %v400_v10 }
  0x9e   : > { %v1474_v16 = vpop.f32.mrf.mxu3 }
  0x9f   : > { %v634_v12 = vpop.f32.mrf.mxu2 }
  0xa0   : > { %v403_v13 = vpop.f32.mrf.mxu0 }
  0xa1   : > { %v601_v14 = vpop.f32.mrf.mxu1 }
  0xa2   : > { %v1486_v39 = vadd.f32 %v601_v14, %v403_v13 }
  0xa4   : > { %v726_v44 = vadd.f32 %v1486_v39, %v1488_v41 }
  0xa6   : > { %v1476_v21 = vpop.f32.mrf.mxu3 }
  0xa7   : > { %v637_v15 = vpop.f32.mrf.mxu2 }
  0xa8   : > { %v406_v18 = vpop.f32.mrf.mxu0 }
  0xa9   : > { %v604_v17 = vpop.f32.mrf.mxu1 }
  0xaa   : > { %v1490_v42 = vadd.f32 %v604_v17, %v400_v10 }
  0xac   : > { %v727_v47 = vadd.f32 %v726_v44, %v1490_v42 }
  0xae   : > { %v1478_v25 = vpop.f32.mrf.mxu3 }
  0xaf   : > { %v640_v19 = vpop.f32.mrf.mxu2 }
  0xb0   : > { %v409_v22 = vpop.f32.mrf.mxu0 }
  0xb1   : > { %v607_v20 = vpop.f32.mrf.mxu1 }
  0xb2   : > { %v1494_v45 = vadd.f32 %v607_v20, %v403_v13 }
  0xb4   : > { %v728_v49 = vadd.f32 %v727_v47, %v1494_v45 }
  0xb6   : > { %v1480_v29 = vpop.f32.mrf.mxu3 }
  0xb7   : > { %v643_v23 = vpop.f32.mrf.mxu2 }
  0xb8   : > { %v412_v26 = vpop.f32.mrf.mxu0 }
  0xb9   : > { %v610_v24 = vpop.f32.mrf.mxu1 }
  0xba   : > { %v1497_v48 = vadd.f32 %v610_v24, %v406_v18 }
  0xbc   : > { %v729_v52 = vadd.f32 %v728_v49, %v1497_v48 }
  0xbe   : > { %v1482_v33 = vpop.f32.mrf.mxu3 }
  0xbf   : > { %v646_v28 = vpop.f32.mrf.mxu2  ;;  %v1559_v49 = vadd.f32 %v1482_v33, %v1474_v16 }
  0xc0   : > { %v415_v30 = vpop.f32.mrf.mxu0 }
  0xc1   : > { %v613_v27 = vpop.f32.mrf.mxu1 }
  0xc2   : > { %v1500_v50 = vadd.f32 %v613_v27, %v409_v22 }
  0xc4   : > { %v730_v55 = vadd.f32 %v729_v52, %v1500_v50 }
  0xc6   : > { %v1484_v38 = vpop.f32.mrf.mxu3 }
  0xc7   : > { %v649_v32 = vpop.f32.mrf.mxu2 }
  0xc8   : > { %v418_v35 = vpop.f32.mrf.mxu0 }
  0xc9   : > { %v616_v31 = vpop.f32.mrf.mxu1  ;;  %v1521_v8 = vadd.f32 %v634_v12, %v418_v35  ;;  %v1527_v13 = vadd.f32 %v640_v19, %v418_v35 }
  0xca   : > { %v1503_v53 = vadd.f32 %v616_v31, %v406_v18 }
  0xcc   : > { %v731_v59 = vadd.f32 %v730_v55, %v1503_v53  ;;  %v1564_v55 = vadd.f32 %v1484_v38, %v1476_v21 }
  0xce   : > { %v676_v51 = vpop.f32.mrf.mxu3 }
  0xcf   : > { %v652_v36 = vpop.f32.mrf.mxu2 }
  0xd0   : > { %v421_v40 = vpop.f32.mrf.mxu0 }
  0xd1   : > { %v619_v34 = vpop.f32.mrf.mxu1  ;;  %v1524_v10 = vadd.f32 %v637_v15, %v421_v40  ;;  %v1530_v20 = vadd.f32 %v643_v23, %v421_v40 }
  0xd2   : > { %v1506_v56 = vadd.f32 %v619_v34, %v409_v22 }
  0xd4   : > { %v732_v61 = vadd.f32 %v731_v59, %v1506_v56 }
  0xd6   : > { %v679_v1 = vpop.f32.mrf.mxu3 }
  0xd7   : > { %v655_v43 = vpop.f32.mrf.mxu2 }
  0xd8   : > { %v424_v54 = vpop.f32.mrf.mxu0 }
  0xd9   : > { %v622_v37 = vpop.f32.mrf.mxu1  ;;  %v1533_v24 = vadd.f32 %v646_v28, %v424_v54 }
  0xda   : > { %v1509_v60 = vadd.f32 %v622_v37, %v412_v26 }
  0xdc   : > { %v733_v63 = vadd.f32 %v732_v61, %v1509_v60  ;;  %v1572_v61 = vadd.f32 %v679_v1, %v1476_v21 }
  0xde   : > { %v682_v17 = vpop.f32.mrf.mxu3 }
  0xdf   : > { %v658_v58 = vpop.f32.mrf.mxu2 }
  0xe0   : > { %v427_v3 = vpop.f32.mrf.mxu0 }
  0xe1   : > { %v625_v46 = vpop.f32.mrf.mxu1  ;;  %v1536_v27 = vadd.f32 %v649_v32, %v427_v3  ;;  %v1542_v31 = vadd.f32 %v655_v43, %v427_v3 }
  0xe2   : > { %v1512_v62 = vadd.f32 %v625_v46, %v415_v30 }
  0xe4   : > { %v734_v2 = vadd.f32 %v733_v63, %v1512_v62  ;;  %v1576_v63 = vadd.f32 %v682_v17, %v1478_v25 }
  0xe6   : > { %v685_v34 = vpop.f32.mrf.mxu3 }
  0xe7   : > { %v661_v7 = vpop.f32.mrf.mxu2  ;;  %v1580_v38 = vadd.f32 %v685_v34, %v1480_v29 }
  0xe8   : > { %v430_v18 = vpop.f32.mrf.mxu0 }
  0xe9   : > { %v628_v57 = vpop.f32.mrf.mxu1  ;;  %v1545_v37 = vadd.f32 %v658_v58, %v430_v18  ;;  %v1568_v58 = vadd.f32 %v676_v51, %v1474_v16 }
  0xea   : > { %v1515_v0 = vadd.f32 %v628_v57, %v412_v26 }
  0xec   : > { %v735_v5 = vadd.f32 %v734_v2, %v1515_v0 }
  0xef   : > { %v664_v26 = vpop.f32.mrf.mxu2 }
  0xf0   : > { %v433_v35 = vpop.f32.mrf.mxu0  ;;  %v1552_v46 = vadd.f32 %v664_v26, %v430_v18 }
  0xf1   : > { %v631_v4 = vpop.f32.mrf.mxu1  ;;  %v1548_v40 = vadd.f32 %v661_v7, %v433_v35 }
  0xf2   : > { %v1519_v6 = vadd.f32 %v631_v4, %v415_v30  ;;  %v1539_v30 = vadd.f32 %v652_v36, %v424_v54  ;;  %v688_v54 = vpop.f32.mrf.mxu3 }
  0xf3   : > { %v1584_v16 = vadd.f32 %v688_v54, %v1478_v25 }
  0xf4   : > { %v736_v9 = vadd.f32 %v735_v5, %v1519_v6 }
  0xf6   : > { %v737_v11 = vadd.f32 %v736_v9, %v1521_v8 }
  0xf7   : > { %v667_v44 = vpop.f32.mrf.mxu2 }
  0xf8   : > { %v738_v14 = vadd.f32 %v737_v11, %v1524_v10  ;;  %v1555_v47 = vadd.f32 %v667_v44, %v433_v35 }
  0xfa   : > { %v739_v22 = vadd.f32 %v738_v14, %v1527_v13  ;;  %v691_v4 = vpop.f32.mrf.mxu3 }
  0xfb   : > { %v1588_v21 = vadd.f32 %v691_v4, %v1480_v29 }
  0xfc   : > { %v740_v12 = vadd.f32 %v739_v22, %v1530_v20 }
  0xfe   : > { %v741_v15 = vadd.f32 %v740_v12, %v1533_v24 }
 0x100   : > { %v742_v19 = vadd.f32 %v741_v15, %v1536_v27 }
 0x102   : > { %v743_v23 = vadd.f32 %v742_v19, %v1539_v30 }
 0x104   : > { %v744_v28 = vadd.f32 %v743_v23, %v1542_v31 }
 0x106   : > { %v745_v32 = vadd.f32 %v744_v28, %v1545_v37 }
 0x108   : > { %v746_v36 = vadd.f32 %v745_v32, %v1548_v40 }
 0x10a   : > { %v747_v43 = vadd.f32 %v746_v36, %v1552_v46 }
 0x10c   : > { %v748_v52 = vadd.f32 %v747_v43, %v1555_v47 }
 0x10e   : > { %v749_v57 = vadd.f32 %v748_v52, %v1559_v49 }
 0x110   : > { %v750_v59 = vadd.f32 %v749_v57, %v1564_v55 }
 0x112   : > { %v751_v33 = vadd.f32 %v750_v59, %v1568_v58 }
 0x114   : > { %v752_v2 = vadd.f32 %v751_v33, %v1572_v61 }
 0x116   : > { %v753_v3 = vadd.f32 %v752_v2, %v1576_v63 }
 0x118   : > { %v754_v51 = vadd.f32 %v753_v3, %v1580_v38 }
 0x11a   : > { %v755_v1 = vadd.f32 %v754_v51, %v1584_v16 }
 0x11c   : > { %v756_v5 = vadd.f32 %v755_v1, %v1588_v21 }
 0x11e   : > { %v757_v7 = vrot.slane %v756_v5, 4 }
 0x120   : > { %v758_v9 = vadd.f32 %v757_v7, %v756_v5 }
 0x122   : > { %v759_v11 = vrot.slane %v758_v9, 2 }
 0x124   : > { %v760_v14 = vadd.f32 %v759_v11, %v758_v9 }
 0x126   : > { %v761_v17 = vrot.slane %v760_v14, 1 }
 0x128   : > { %v1592_v18 = vadd.f32 %v761_v17, %v760_v14 }
 0x12a   : > { %v1595_v22 = vmul.f32 0.00390625, %v1592_v18 }
 0x12c   : > { %v764_v25 = vsub.f32 %v1488_v41, %v1595_v22  ;;  %v765_v29 = vsub.f32 %v1486_v39, %v1595_v22  ;;  %v766_v12 = vsub.f32 %v1490_v42, %v1595_v22  ;;  %v767_v19 = vsub.f32 %v1494_v45, %v1595_v22 }
 0x12d   : > { %v768_v23 = vsub.f32 %v1497_v48, %v1595_v22  ;;  %v769_v28 = vsub.f32 %v1500_v50, %v1595_v22  ;;  %v770_v39 = vsub.f32 %v1503_v53, %v1595_v22  ;;  %v771_v36 = vsub.f32 %v1506_v56, %v1595_v22 }
 0x12e   : > { %v796_v26 = vmul.f32 %v764_v25, %v764_v25  ;;  %v797_v15 = vmul.f32 %v765_v29, %v765_v29  ;;  %v798_v34 = vmul.f32 %v766_v12, %v766_v12  ;;  %v799_v41 = vmul.f32 %v767_v19, %v767_v19 }
 0x12f   : > { %v800_v44 = vmul.f32 %v768_v23, %v768_v23  ;;  %v801_v43 = vmul.f32 %v769_v28, %v769_v28  ;;  %v772_v48 = vsub.f32 %v1509_v60, %v1595_v22  ;;  %v802_v52 = vmul.f32 %v770_v39, %v770_v39 }
 0x130   : > { %v828_v35 = vadd.f32 %v797_v15, %v796_v26  ;;  %v773_v50 = vsub.f32 %v1512_v62, %v1595_v22  ;;  %v803_v57 = vmul.f32 %v771_v36, %v771_v36  ;;  %v774_v53 = vsub.f32 %v1515_v0, %v1595_v22 }
 0x131   : > { %v804_v33 = vmul.f32 %v772_v48, %v772_v48  ;;  %v775_v56 = vsub.f32 %v1519_v6, %v1595_v22  ;;  %v776_v60 = vsub.f32 %v1521_v8, %v1595_v22  ;;  %v777_v62 = vsub.f32 %v1524_v10, %v1595_v22 }
 0x132   : > { %v829_v32 = vadd.f32 %v828_v35, %v798_v34  ;;  %v805_v3 = vmul.f32 %v773_v50, %v773_v50  ;;  %v806_v51 = vmul.f32 %v774_v53, %v774_v53  ;;  %v778_v0 = vsub.f32 %v1527_v13, %v1595_v22 }
 0x133   : > { %v807_v5 = vmul.f32 %v775_v56, %v775_v56  ;;  %v808_v9 = vmul.f32 %v776_v60, %v776_v60  ;;  %v779_v6 = vsub.f32 %v1530_v20, %v1595_v22  ;;  %v809_v14 = vmul.f32 %v777_v62, %v777_v62 }
 0x134   : > { %v830_v42 = vadd.f32 %v829_v32, %v799_v41  ;;  %v780_v8 = vsub.f32 %v1533_v24, %v1595_v22  ;;  %v810_v25 = vmul.f32 %v778_v0, %v778_v0  ;;  %v781_v10 = vsub.f32 %v1536_v27, %v1595_v22 }
 0x135   : > { %v811_v12 = vmul.f32 %v779_v6, %v779_v6  ;;  %v782_v13 = vsub.f32 %v1539_v30, %v1595_v22  ;;  %v783_v20 = vsub.f32 %v1542_v31, %v1595_v22  ;;  %v784_v24 = vsub.f32 %v1545_v37, %v1595_v22 }
 0x136   : > { %v831_v45 = vadd.f32 %v830_v42, %v800_v44  ;;  %v812_v15 = vmul.f32 %v780_v8, %v780_v8  ;;  %v813_v23 = vmul.f32 %v781_v10, %v781_v10  ;;  %v785_v27 = vsub.f32 %v1548_v40, %v1595_v22 }
 0x137   : > { %v814_v35 = vmul.f32 %v782_v13, %v782_v13  ;;  %v815_v41 = vmul.f32 %v783_v20, %v783_v20  ;;  %v786_v30 = vsub.f32 %v1552_v46, %v1595_v22  ;;  %v816_v39 = vmul.f32 %v784_v24, %v784_v24 }
 0x138   : > { %v832_v54 = vadd.f32 %v831_v45, %v801_v43  ;;  %v787_v31 = vsub.f32 %v1555_v47, %v1595_v22  ;;  %v817_v42 = vmul.f32 %v785_v27, %v785_v27  ;;  %v788_v37 = vsub.f32 %v1559_v49, %v1595_v22 }
 0x139   : > { %v818_v43 = vmul.f32 %v786_v30, %v786_v30  ;;  %v789_v40 = vsub.f32 %v1564_v55, %v1595_v22  ;;  %v790_v46 = vsub.f32 %v1568_v58, %v1595_v22  ;;  %v791_v47 = vsub.f32 %v1572_v61, %v1595_v22 }
 0x13a   : > { %v833_v59 = vadd.f32 %v832_v54, %v802_v52  ;;  %v819_v48 = vmul.f32 %v787_v31, %v787_v31  ;;  %v820_v54 = vmul.f32 %v788_v37, %v788_v37  ;;  %v792_v49 = vsub.f32 %v1576_v63, %v1595_v22 }
 0x13b   : > { %v822_v53 = vmul.f32 %v790_v46, %v790_v46  ;;  %v793_v55 = vsub.f32 %v1580_v38, %v1595_v22 }
 0x13c   : > { %v834_v2 = vadd.f32 %v833_v59, %v803_v57  ;;  %v821_v57 = vmul.f32 %v789_v40, %v789_v40  ;;  %v824_v58 = vmul.f32 %v792_v49, %v792_v49 }
 0x13d   : > { %v825_v61 = vmul.f32 %v793_v55, %v793_v55 }
 0x13e   : > { %v835_v4 = vadd.f32 %v834_v2, %v804_v33  ;;  %v823_v2 = vmul.f32 %v791_v47, %v791_v47 }
 0x140   : > { %v836_v1 = vadd.f32 %v835_v4, %v805_v3  ;;  %v794_v4 = vsub.f32 %v1584_v16, %v1595_v22 }
 0x142   : > { %v837_v7 = vadd.f32 %v836_v1, %v806_v51  ;;  %v795_v51 = vsub.f32 %v1588_v21, %v1595_v22  ;;  %v826_v1 = vmul.f32 %v794_v4, %v794_v4 }
 0x144   : > { %v838_v11 = vadd.f32 %v837_v7, %v807_v5  ;;  %v827_v62 = vmul.f32 %v795_v51, %v795_v51 }
 0x146   : > { %v839_v17 = vadd.f32 %v838_v11, %v808_v9 }
 0x148   : > { %v840_v29 = vadd.f32 %v839_v17, %v809_v14 }
 0x14a   : > { %v841_v26 = vadd.f32 %v840_v29, %v810_v25 }
 0x14c   : > { %v842_v19 = vadd.f32 %v841_v26, %v811_v12 }
 0x14e   : > { %v843_v34 = vadd.f32 %v842_v19, %v812_v15 }
 0x150   : > { %v844_v28 = vadd.f32 %v843_v34, %v813_v23 }
 0x152   : > { %v845_v32 = vadd.f32 %v844_v28, %v814_v35 }
 0x154   : > { %v846_v44 = vadd.f32 %v845_v32, %v815_v41 }
 0x156   : > { %v847_v36 = vadd.f32 %v846_v44, %v816_v39 }
 0x158   : > { %v848_v45 = vadd.f32 %v847_v36, %v817_v42 }
 0x15a   : > { %v849_v52 = vadd.f32 %v848_v45, %v818_v43 }
 0x15c   : > { %v850_v50 = vadd.f32 %v849_v52, %v819_v48 }
 0x15e   : > { %v851_v59 = vadd.f32 %v850_v50, %v820_v54 }
 0x160   : > { %v852_v33 = vadd.f32 %v851_v59, %v821_v57 }
 0x162   : > { %v853_v56 = vadd.f32 %v852_v33, %v822_v53 }
 0x164   : > { %v854_v3 = vadd.f32 %v853_v56, %v823_v2 }
 0x166   : > { %v855_v60 = vadd.f32 %v854_v3, %v824_v58 }
 0x168   : > { %v856_v63 = vadd.f32 %v855_v60, %v825_v61 }
 0x16a   : > { %v857_v5 = vadd.f32 %v856_v63, %v826_v1 }
 0x16c   : > { %v858_v7 = vadd.f32 %v857_v5, %v827_v62 }
 0x16e   : > { %v859_v38 = vrot.slane %v858_v7, 4 }
 0x170   : > { %v860_v0 = vadd.f32 %v859_v38, %v858_v7 }
 0x172   : > { %v861_v9 = vrot.slane %v860_v0, 2 }
 0x174   : > { %v862_v16 = vadd.f32 %v861_v9, %v860_v0 }
 0x176   : > { %v863_v11 = vrot.slane %v862_v16, 1 }
 0x178   : > { %v864_v21 = vadd.f32 %v863_v11, %v862_v16 }
 0x17a   : > { %v866_v22 = vsel %vm865_vm3, %v1592_v18, %v864_v21 }
 0x17b   : > { %867 = vst [vmem:[%s245_s6] sm:$0x3] %v866_v22 }
 0x17c   : > { %1251 = shalt.err (!%p1248_p5)
}
 0x17d   : > { %1169 = dma.vmem_to_hbm [thread:$0]  (%p1369_p4), %s883_s7, 32, %s885_s8, %s869_s9  }
 0x17e PF: > { %p1175_p6 = scmp.ge.s32.totalorder %s1302_s20, 2  ;;  %s896_s22 = sand.u32 1, %s1282_s15  }
 0x17f   : > { %s897_s24 = scalar_lea.sflag [#allocation3], %s896_s22 }
 0x180   : > { %p1172_p7 = pnand %p1175_p6, %p1376_p8 }
 0x182   : > { %p1173_p9 = pneg %p1172_p7 }
 0x184   : > { %1277 = dma.done.wait (%p1173_p9), %s897_s24, 32  }
 0x185   : > { %1279 = vsyncadd (%p1173_p9), %s897_s24, 4294967264  ;;  %s17_s20 = sadd.s32 1, %s1302_s20   ;;  %s1706_s15 = smov %s1286_s16 }
 0x186   : > { %p14_p10 = scmp.ge.s32.totalorder %s17_s20, 4   ;;  %s1707_s16 = smov %s1290_s17 }
 0x187   : > { %s1708_s17 = smov %s1382_s28  ;;  %s1709_s18 = smov %s1298_s19 }
 0x188   : > { %s1710_s19 = smov %s1712_s23  ;;  %16 = sbr.rel (!%p14_p10) target bundleno = 4 (0x4), region = 74 }
 0x18d   :  { %903 = vsyncpa [#allocation3], 1 }
 0x18e   :  { %905 = vsyncpa [#allocation3 + $0x1], 1 }

</bundles_post_ra>
